<compile_context>
chip_gen: v6e
topology: v6e:2x2x1
jax: 0.10.0
libtpu: 0.0.40
codegen_flags: <defaults>
</compile_context>

<pallas_src>
import functools

import jax
import jax.numpy as jnp
import numpy as np
from jax import lax
from jax.experimental import pallas as pl
from jax.experimental.pallas import tpu as pltpu


def _gelu_exact(v):
    # nn.GELU() default: exact erf-based GELU
    return 0.5 * v * (1.0 + lax.erf(v * 0.7071067811865476))


def ffn_kernel(x_ref, w0_ref, b0_ref, w1_ref, b1_ref, w2_ref, b2_ref,
               mask_ref, o_ref, *, H, W):
    # x_ref: (1, C, H*W) -- one image per grid step, channels on sublanes,
    # spatial on lanes (lane-dense last dim).
    HW = H * W
    p = w1_ref.shape[0]                                     # p_dim

    x = x_ref[0].astype(jnp.float32)                        # (C, HW)

    # conv_0: 1x1 conv == (hidden, C) @ (C, HW) matmul, then GELU.
    # (Operands kept f32 here to preserve the tight correctness tolerance;
    #  for production sizes on v6e/v7x the dot operands could be bf16 with
    #  f32 accumulation.)
    h = jnp.dot(w0_ref[...], x, preferred_element_type=jnp.float32)
    h = _gelu_exact(h + b0_ref[...])                        # (hidden, HW)

    # conv_1: 3x3 "SAME" conv on the first p channels.  Build the 9 shifted
    # windows with lane rotations + precomputed border mask, stack them along
    # the contraction axis, and do ONE K=9*p matmul (im2col).
    h1 = h[:p, :]                                           # (p, HW)
    mask = mask_ref[...]                                    # (9, HW) of 0/1
    wins = []
    for ky in range(3):
        for kx in range(3):
            t = ky * 3 + kx
            d = (ky - 1) * W + (kx - 1)      # flattened spatial offset
            win = h1 if d == 0 else pltpu.roll(h1, (-d) % HW, axis=1)
            wins.append(win * mask[t:t + 1, :])
    im2col = jnp.concatenate(wins, axis=0)                  # (9*p, HW)
    c1 = jnp.dot(w1_ref[...], im2col, preferred_element_type=jnp.float32)
    y1 = _gelu_exact(c1 + b1_ref[...])                      # (p, HW)

    # conv_2: single 1x1 conv on the channel (sublane) concat [y1, h[p:]].
    y = jnp.concatenate([y1, h[p:, :]], axis=0)             # (hidden, HW)
    out = jnp.dot(w2_ref[...], y, preferred_element_type=jnp.float32)
    out = out + b2_ref[...]                                 # (C, HW)
    o_ref[0] = out.astype(o_ref.dtype)


def ffn_pallas(x_nchw, w0, b0, w1, b1, w2, b2, p_dim):
    N, C, H, W = x_nchw.shape
    HW = H * W
    hidden = w0.shape[1]

    # NCHW -> (N, C, H*W): pure reshape, no transpose.
    x_flat = x_nchw.reshape(N, C, HW)

    # Matmul-friendly weight layouts (out-channels on rows).
    w0k = jnp.transpose(w0)                                     # (hidden, C)
    b0k = jnp.reshape(b0, (hidden, 1))
    w1k = jnp.transpose(w1, (2, 0, 1)).reshape(p_dim, 9 * p_dim)  # (p, 9p)
    b1k = jnp.reshape(b1, (p_dim, 1))
    w2k = jnp.transpose(w2)                                     # (C, hidden)
    b2k = jnp.reshape(b2, (C, 1))

    # Border-validity mask for the 9 taps of the 3x3 SAME conv, flattened
    # over spatial, so rolled windows never leak across rows / images.
    yy, xx = jnp.meshgrid(jnp.arange(H), jnp.arange(W), indexing="ij")
    masks = []
    for ky in range(3):
        for kx in range(3):
            dy, dx = ky - 1, kx - 1
            ok = ((yy + dy >= 0) & (yy + dy < H) &
                  (xx + dx >= 0) & (xx + dx < W))
            masks.append(ok.reshape(HW))
    mask = jnp.stack(masks, axis=0).astype(jnp.float32)         # (9, HW)

    kernel = functools.partial(ffn_kernel, H=H, W=W)
    out_flat = pl.pallas_call(
        kernel,
        out_shape=jax.ShapeDtypeStruct((N, C, HW), x_nchw.dtype),
        grid_spec=pltpu.PrefetchScalarGridSpec(
            num_scalar_prefetch=0,
            grid=(N,),   # N=2: keeps both v7x TCs busy; only 2 steps on v5e/v6e
            in_specs=[
                pl.BlockSpec((1, C, HW), lambda n: (n, 0, 0)),
                pl.BlockSpec(w0k.shape, lambda n: (0, 0)),
                pl.BlockSpec(b0k.shape, lambda n: (0, 0)),
                pl.BlockSpec(w1k.shape, lambda n: (0, 0)),
                pl.BlockSpec(b1k.shape, lambda n: (0, 0)),
                pl.BlockSpec(w2k.shape, lambda n: (0, 0)),
                pl.BlockSpec(b2k.shape, lambda n: (0, 0)),
                pl.BlockSpec(mask.shape, lambda n: (0, 0)),
            ],
            out_specs=pl.BlockSpec((1, C, HW), lambda n: (n, 0, 0)),
        ),
        compiler_params=pltpu.CompilerParams(
            dimension_semantics=("parallel",)),
    )(x_flat, w0k, b0k, w1k, b1k, w2k, b2k, mask)
    return out_flat.reshape(N, C, H, W)


def ffn_reference(x, w0, b0, w1, b1, w2, b2, p_dim):
    # Pure-JAX NCHW reference (for a sanity check against the kernel).
    hp = lax.Precision.HIGHEST
    h = jnp.einsum('nchw,cd->ndhw', x, w0, precision=hp) + b0[0][None, :, None, None]
    h = _gelu_exact(h)
    h1 = h[:, :p_dim]
    w1_oihw = jnp.transpose(w1.reshape(3, 3, p_dim, p_dim), (3, 2, 0, 1))
    c1 = lax.conv_general_dilated(
        h1, w1_oihw, window_strides=(1, 1), padding='SAME',
        dimension_numbers=('NCHW', 'OIHW', 'NCHW'), precision=hp)
    c1 = _gelu_exact(c1 + b1[0][None, :, None, None])
    y = jnp.concatenate([c1, h[:, p_dim:]], axis=1)
    out = (jnp.einsum('nchw,cd->ndhw', y, w2, precision=hp)
           + b2[0][None, :, None, None])
    return out


if __name__ == "__main__":
    # Module config: dim=4, growth_rate=2.0 -> hidden=8, p_rate=0.25 -> p_dim=2
    dim, growth_rate, p_rate = 4, 2.0, 0.25
    hidden = int(dim * growth_rate)
    p_dim = int(hidden * p_rate)
    N, H, W = 2, 16, 16

    key = jax.random.PRNGKey(0)
    k = jax.random.split(key, 7)
    # Deterministic synthetic parameters (matmul-friendly generation layout:
    # 1x1 conv weights are (Cin, Cout), 3x3 weight is (kh*kw, Cin, Cout)).
    w0 = jax.random.normal(k[0], (dim, hidden), jnp.float32) * 0.2
    b0 = jax.random.normal(k[1], (1, hidden), jnp.float32) * 0.1
    w1 = jax.random.normal(k[2], (9, p_dim, p_dim), jnp.float32) * 0.2
    b1 = jax.random.normal(k[3], (1, p_dim), jnp.float32) * 0.1
    w2 = jax.random.normal(k[4], (hidden, dim), jnp.float32) * 0.2
    b2 = jax.random.normal(k[5], (1, dim), jnp.float32) * 0.1
    x = jax.random.normal(k[6], (N, dim, H, W), jnp.float32)

    out = jax.block_until_ready(ffn_pallas(x, w0, b0, w1, b1, w2, b2, p_dim))
    ref = jax.block_until_ready(ffn_reference(x, w0, b0, w1, b1, w2, b2, p_dim))
    np.testing.assert_allclose(np.asarray(out), np.asarray(ref),
                               rtol=1e-3, atol=1e-3)
    print("KERNEL_OK")
</pallas_src>

<mosaic_0001>
module attributes {stable_mosaic.version = 11 : i64} {
  func.func @ffn_kernel(%arg0: i32, %arg1: memref<1x4x256xf32, #tpu.memory_space<vmem>>, %arg2: memref<8x4xf32, #tpu.memory_space<vmem>>, %arg3: memref<8x1xf32, #tpu.memory_space<vmem>>, %arg4: memref<2x18xf32, #tpu.memory_space<vmem>>, %arg5: memref<2x1xf32, #tpu.memory_space<vmem>>, %arg6: memref<4x8xf32, #tpu.memory_space<vmem>>, %arg7: memref<4x1xf32, #tpu.memory_space<vmem>>, %arg8: memref<9x256xf32, #tpu.memory_space<vmem>>, %arg9: memref<1x4x256xf32, #tpu.memory_space<vmem>>) attributes {dimension_semantics = [#tpu.dimension_semantics<parallel>], iteration_bounds = array<i64: 2>, scalar_prefetch = 0 : i64, scratch_operands = 0 : i64, tpu.core_type = #tpu.core_type<tc>, window_params = [{transform_indices = @transform_0, window_bounds = array<i64: 1, 4, 256>}, {pipeline_mode = #tpu.pipeline_mode<synchronous>, transform_indices = @transform_1, window_bounds = array<i64: 8, 4>}, {pipeline_mode = #tpu.pipeline_mode<synchronous>, transform_indices = @transform_2, window_bounds = array<i64: 8, 1>}, {pipeline_mode = #tpu.pipeline_mode<synchronous>, transform_indices = @transform_3, window_bounds = array<i64: 2, 18>}, {pipeline_mode = #tpu.pipeline_mode<synchronous>, transform_indices = @transform_4, window_bounds = array<i64: 2, 1>}, {pipeline_mode = #tpu.pipeline_mode<synchronous>, transform_indices = @transform_5, window_bounds = array<i64: 4, 8>}, {pipeline_mode = #tpu.pipeline_mode<synchronous>, transform_indices = @transform_6, window_bounds = array<i64: 4, 1>}, {pipeline_mode = #tpu.pipeline_mode<synchronous>, transform_indices = @transform_7, window_bounds = array<i64: 9, 256>}, {transform_indices = @transform_8, window_bounds = array<i64: 1, 4, 256>}]} {
    %c0 = arith.constant 0 : index
    %c0_0 = arith.constant 0 : index
    %c0_1 = arith.constant 0 : index
    %0 = vector.load %arg1[%c0, %c0_0, %c0_1] : memref<1x4x256xf32, #tpu.memory_space<vmem>>, vector<1x4x256xf32>
    %1 = vector.shape_cast %0 : vector<1x4x256xf32> to vector<4x256xf32>
    %c0_2 = arith.constant 0 : index
    %c0_3 = arith.constant 0 : index
    %2 = vector.load %arg2[%c0_2, %c0_3] : memref<8x4xf32, #tpu.memory_space<vmem>>, vector<8x4xf32>
    %cst = arith.constant dense<0.000000e+00> : vector<8x256xf32>
    %3 = tpu.matmul %2, %1, %cst {dimension_numbers = #tpu.dot_dimension_numbers<[1], [0], [0], [1], [0, 0, 1, 1], [], []>} : vector<8x4xf32>, vector<4x256xf32>, vector<8x256xf32> -> vector<8x256xf32>
    %c0_4 = arith.constant 0 : index
    %c0_5 = arith.constant 0 : index
    %4 = vector.load %arg3[%c0_4, %c0_5] : memref<8x1xf32, #tpu.memory_space<vmem>>, vector<8x1xf32>
    %5 = vector.broadcast %4 : vector<8x1xf32> to vector<8x256xf32>
    %6 = arith.addf %3, %5 : vector<8x256xf32>
    %cst_6 = arith.constant 5.000000e-01 : f32
    %7 = vector.broadcast %cst_6 : f32 to vector<8x256xf32>
    %8 = arith.mulf %7, %6 : vector<8x256xf32>
    %cst_7 = arith.constant 0.707106769 : f32
    %9 = vector.broadcast %cst_7 : f32 to vector<8x256xf32>
    %10 = arith.mulf %6, %9 : vector<8x256xf32>
    %11 = math.erf %10 : vector<8x256xf32>
    %cst_8 = arith.constant 1.000000e+00 : f32
    %12 = vector.broadcast %cst_8 : f32 to vector<8x256xf32>
    %13 = arith.addf %12, %11 : vector<8x256xf32>
    %14 = arith.mulf %8, %13 : vector<8x256xf32>
    %15 = vector.extract_strided_slice %14 {offsets = [0, 0], sizes = [2, 256], strides = [1, 1]} : vector<8x256xf32> to vector<2x256xf32>
    %c0_9 = arith.constant 0 : index
    %c0_10 = arith.constant 0 : index
    %16 = vector.load %arg8[%c0_9, %c0_10] : memref<9x256xf32, #tpu.memory_space<vmem>>, vector<9x256xf32>
    %c17_i32 = arith.constant 17 : i32
    %17 = tpu.dynamic_rotate %15 by %c17_i32 dim 1 : vector<2x256xf32>, i32 -> vector<2x256xf32>
    %18 = vector.extract_strided_slice %16 {offsets = [0, 0], sizes = [1, 256], strides = [1, 1]} : vector<9x256xf32> to vector<1x256xf32>
    %19 = vector.broadcast %18 : vector<1x256xf32> to vector<2x256xf32>
    %20 = arith.mulf %17, %19 : vector<2x256xf32>
    %c16_i32 = arith.constant 16 : i32
    %21 = tpu.dynamic_rotate %15 by %c16_i32 dim 1 : vector<2x256xf32>, i32 -> vector<2x256xf32>
    %22 = vector.extract_strided_slice %16 {offsets = [1, 0], sizes = [1, 256], strides = [1, 1]} : vector<9x256xf32> to vector<1x256xf32>
    %23 = vector.broadcast %22 : vector<1x256xf32> to vector<2x256xf32>
    %24 = arith.mulf %21, %23 : vector<2x256xf32>
    %c15_i32 = arith.constant 15 : i32
    %25 = tpu.dynamic_rotate %15 by %c15_i32 dim 1 : vector<2x256xf32>, i32 -> vector<2x256xf32>
    %26 = vector.extract_strided_slice %16 {offsets = [2, 0], sizes = [1, 256], strides = [1, 1]} : vector<9x256xf32> to vector<1x256xf32>
    %27 = vector.broadcast %26 : vector<1x256xf32> to vector<2x256xf32>
    %28 = arith.mulf %25, %27 : vector<2x256xf32>
    %c1_i32 = arith.constant 1 : i32
    %29 = tpu.dynamic_rotate %15 by %c1_i32 dim 1 : vector<2x256xf32>, i32 -> vector<2x256xf32>
    %30 = vector.extract_strided_slice %16 {offsets = [3, 0], sizes = [1, 256], strides = [1, 1]} : vector<9x256xf32> to vector<1x256xf32>
    %31 = vector.broadcast %30 : vector<1x256xf32> to vector<2x256xf32>
    %32 = arith.mulf %29, %31 : vector<2x256xf32>
    %33 = vector.extract_strided_slice %16 {offsets = [4, 0], sizes = [1, 256], strides = [1, 1]} : vector<9x256xf32> to vector<1x256xf32>
    %34 = vector.broadcast %33 : vector<1x256xf32> to vector<2x256xf32>
    %35 = arith.mulf %15, %34 : vector<2x256xf32>
    %c255_i32 = arith.constant 255 : i32
    %36 = tpu.dynamic_rotate %15 by %c255_i32 dim 1 : vector<2x256xf32>, i32 -> vector<2x256xf32>
    %37 = vector.extract_strided_slice %16 {offsets = [5, 0], sizes = [1, 256], strides = [1, 1]} : vector<9x256xf32> to vector<1x256xf32>
    %38 = vector.broadcast %37 : vector<1x256xf32> to vector<2x256xf32>
    %39 = arith.mulf %36, %38 : vector<2x256xf32>
    %c241_i32 = arith.constant 241 : i32
    %40 = tpu.dynamic_rotate %15 by %c241_i32 dim 1 : vector<2x256xf32>, i32 -> vector<2x256xf32>
    %41 = vector.extract_strided_slice %16 {offsets = [6, 0], sizes = [1, 256], strides = [1, 1]} : vector<9x256xf32> to vector<1x256xf32>
    %42 = vector.broadcast %41 : vector<1x256xf32> to vector<2x256xf32>
    %43 = arith.mulf %40, %42 : vector<2x256xf32>
    %c240_i32 = arith.constant 240 : i32
    %44 = tpu.dynamic_rotate %15 by %c240_i32 dim 1 : vector<2x256xf32>, i32 -> vector<2x256xf32>
    %45 = vector.extract_strided_slice %16 {offsets = [7, 0], sizes = [1, 256], strides = [1, 1]} : vector<9x256xf32> to vector<1x256xf32>
    %46 = vector.broadcast %45 : vector<1x256xf32> to vector<2x256xf32>
    %47 = arith.mulf %44, %46 : vector<2x256xf32>
    %c239_i32 = arith.constant 239 : i32
    %48 = tpu.dynamic_rotate %15 by %c239_i32 dim 1 : vector<2x256xf32>, i32 -> vector<2x256xf32>
    %49 = vector.extract_strided_slice %16 {offsets = [8, 0], sizes = [1, 256], strides = [1, 1]} : vector<9x256xf32> to vector<1x256xf32>
    %50 = vector.broadcast %49 : vector<1x256xf32> to vector<2x256xf32>
    %51 = arith.mulf %48, %50 : vector<2x256xf32>
    %52 = tpu.concatenate %20, %24, %28, %32, %35, %39, %43, %47, %51 in 0 : vector<2x256xf32>, vector<2x256xf32>, vector<2x256xf32>, vector<2x256xf32>, vector<2x256xf32>, vector<2x256xf32>, vector<2x256xf32>, vector<2x256xf32>, vector<2x256xf32> -> vector<18x256xf32>
    %c0_11 = arith.constant 0 : index
    %c0_12 = arith.constant 0 : index
    %53 = vector.load %arg4[%c0_11, %c0_12] : memref<2x18xf32, #tpu.memory_space<vmem>>, vector<2x18xf32>
    %cst_13 = arith.constant dense<0.000000e+00> : vector<2x256xf32>
    %54 = tpu.matmul %53, %52, %cst_13 {dimension_numbers = #tpu.dot_dimension_numbers<[1], [0], [0], [1], [0, 0, 1, 1], [], []>} : vector<2x18xf32>, vector<18x256xf32>, vector<2x256xf32> -> vector<2x256xf32>
    %c0_14 = arith.constant 0 : index
    %c0_15 = arith.constant 0 : index
    %55 = vector.load %arg5[%c0_14, %c0_15] : memref<2x1xf32, #tpu.memory_space<vmem>>, vector<2x1xf32>
    %56 = vector.broadcast %55 : vector<2x1xf32> to vector<2x256xf32>
    %57 = arith.addf %54, %56 : vector<2x256xf32>
    %cst_16 = arith.constant 5.000000e-01 : f32
    %58 = vector.broadcast %cst_16 : f32 to vector<2x256xf32>
    %59 = arith.mulf %58, %57 : vector<2x256xf32>
    %cst_17 = arith.constant 0.707106769 : f32
    %60 = vector.broadcast %cst_17 : f32 to vector<2x256xf32>
    %61 = arith.mulf %57, %60 : vector<2x256xf32>
    %62 = math.erf %61 : vector<2x256xf32>
    %cst_18 = arith.constant 1.000000e+00 : f32
    %63 = vector.broadcast %cst_18 : f32 to vector<2x256xf32>
    %64 = arith.addf %63, %62 : vector<2x256xf32>
    %65 = arith.mulf %59, %64 : vector<2x256xf32>
    %66 = vector.extract_strided_slice %14 {offsets = [2, 0], sizes = [6, 256], strides = [1, 1]} : vector<8x256xf32> to vector<6x256xf32>
    %67 = tpu.concatenate %65, %66 in 0 : vector<2x256xf32>, vector<6x256xf32> -> vector<8x256xf32>
    %c0_19 = arith.constant 0 : index
    %c0_20 = arith.constant 0 : index
    %68 = vector.load %arg6[%c0_19, %c0_20] : memref<4x8xf32, #tpu.memory_space<vmem>>, vector<4x8xf32>
    %cst_21 = arith.constant dense<0.000000e+00> : vector<4x256xf32>
    %69 = tpu.matmul %68, %67, %cst_21 {dimension_numbers = #tpu.dot_dimension_numbers<[1], [0], [0], [1], [0, 0, 1, 1], [], []>} : vector<4x8xf32>, vector<8x256xf32>, vector<4x256xf32> -> vector<4x256xf32>
    %c0_22 = arith.constant 0 : index
    %c0_23 = arith.constant 0 : index
    %70 = vector.load %arg7[%c0_22, %c0_23] : memref<4x1xf32, #tpu.memory_space<vmem>>, vector<4x1xf32>
    %71 = vector.broadcast %70 : vector<4x1xf32> to vector<4x256xf32>
    %72 = arith.addf %69, %71 : vector<4x256xf32>
    %c0_24 = arith.constant 0 : index
    %c0_25 = arith.constant 0 : index
    %c0_26 = arith.constant 0 : index
    %73 = vector.load %arg9[%c0_24, %c0_25, %c0_26] : memref<1x4x256xf32, #tpu.memory_space<vmem>>, vector<1x4x256xf32>
    %74 = vector.shape_cast %73 : vector<1x4x256xf32> to vector<4x256xf32>
    %75 = vector.shape_cast %72 : vector<4x256xf32> to vector<1x4x256xf32>
    tpu.vector_store %arg9[%c0_24, %c0_25, %c0_26], %75 {strides = array<i32>} : memref<1x4x256xf32, #tpu.memory_space<vmem>>, vector<1x4x256xf32>,
    return
  }
  func.func @transform_0(%arg0: i32) -> (i32, i32, i32) {
    %c0_i32 = arith.constant 0 : i32
    %c0_i32_0 = arith.constant 0 : i32
    %c0_i32_1 = arith.constant 0 : i32
    return %arg0, %c0_i32, %c0_i32_0 : i32, i32, i32
  }
  func.func @transform_1(%arg0: i32) -> (i32, i32) {
    %c0_i32 = arith.constant 0 : i32
    %c0_i32_0 = arith.constant 0 : i32
    %c0_i32_1 = arith.constant 0 : i32
    return %c0_i32, %c0_i32_0 : i32, i32
  }
  func.func @transform_2(%arg0: i32) -> (i32, i32) {
    %c0_i32 = arith.constant 0 : i32
    %c0_i32_0 = arith.constant 0 : i32
    %c0_i32_1 = arith.constant 0 : i32
    return %c0_i32, %c0_i32_0 : i32, i32
  }
  func.func @transform_3(%arg0: i32) -> (i32, i32) {
    %c0_i32 = arith.constant 0 : i32
    %c0_i32_0 = arith.constant 0 : i32
    %c0_i32_1 = arith.constant 0 : i32
    return %c0_i32, %c0_i32_0 : i32, i32
  }
  func.func @transform_4(%arg0: i32) -> (i32, i32) {
    %c0_i32 = arith.constant 0 : i32
    %c0_i32_0 = arith.constant 0 : i32
    %c0_i32_1 = arith.constant 0 : i32
    return %c0_i32, %c0_i32_0 : i32, i32
  }
  func.func @transform_5(%arg0: i32) -> (i32, i32) {
    %c0_i32 = arith.constant 0 : i32
    %c0_i32_0 = arith.constant 0 : i32
    %c0_i32_1 = arith.constant 0 : i32
    return %c0_i32, %c0_i32_0 : i32, i32
  }
  func.func @transform_6(%arg0: i32) -> (i32, i32) {
    %c0_i32 = arith.constant 0 : i32
    %c0_i32_0 = arith.constant 0 : i32
    %c0_i32_1 = arith.constant 0 : i32
    return %c0_i32, %c0_i32_0 : i32, i32
  }
  func.func @transform_7(%arg0: i32) -> (i32, i32) {
    %c0_i32 = arith.constant 0 : i32
    %c0_i32_0 = arith.constant 0 : i32
    %c0_i32_1 = arith.constant 0 : i32
    return %c0_i32, %c0_i32_0 : i32, i32
  }
  func.func @transform_8(%arg0: i32) -> (i32, i32, i32) {
    %c0_i32 = arith.constant 0 : i32
    %c0_i32_0 = arith.constant 0 : i32
    %c0_i32_1 = arith.constant 0 : i32
    return %arg0, %c0_i32, %c0_i32_0 : i32, i32, i32
  }
}

</mosaic_0001>

<bundles_post_ra>
// kernel: tpu_custom_call.1
= control target key start
LH: loop header
LB: loop body
LE: loop exit
PB: predicated region body
PF: predicated region fallthrough
CT: control target
= control target key end

     0   :  { %13 = vsyncpa [#allocation3], 0  ;;  %s1418_s0 = inlined_call_operand.hbm [shape: f32[2,4,256], index: 0, kind: input, shape index: {}]   ;;  %s1419_s1 = inlined_call_operand.vmem [shape: f32[8,4], index: 1, kind: input, shape index: {}]   ;;  %s1420_s2 = inlined_call_operand.vmem [shape: f32[8,1], index: 2, kind: input, shape index: {}]   ;;  %s1421_s3 = inlined_call_operand.vmem [shape: f32[2,18], index: 3, kind: input, shape index: {}]   ;;  %s1422_s4 = inlined_call_operand.vmem [shape: f32[2,1], index: 4, kind: input, shape index: {}]   ;;  %s1423_s5 = inlined_call_operand.vmem [shape: f32[4,8], index: 5, kind: input, shape index: {}]   ;;  %s1424_s6 = inlined_call_operand.vmem [shape: f32[4,1], index: 6, kind: input, shape index: {}]   ;;  %s1425_s7 = inlined_call_operand.vmem [shape: f32[9,256], index: 7, kind: input, shape index: {}]   ;;  %s1426_s8 = inlined_call_operand.hbm [shape: f32[2,4,256], index: 8, kind: output, shape index: {}]  }
   0x1   :  { %15 = vsyncpa [#allocation3 + $0x1], 0 }
   0x2   :  { %16 = vsyncpa [#allocation4], 0 }
   0x3   :  { %18 = vsyncpa [#allocation4 + $0x1], 0  ;;  %s1139_s27 = smov 0   ;;  %s1141_s28 = smov 0  }
   0x4   :  { %s1143_s29 = smov 0   ;;  %s1145_s30 = smov 0  }
   0x5 LB: > { %s1160_s9 = sadd.s32 4294967295, %s1080_s30   ;;  %s896_s10 = sadd.s32 4294967294, %s1080_s30   ;;  %s1080_s30 = sphi %s1145_s30, %s1445_s30   ;;  %s1076_s29 = sphi %s1143_s29, %s1444_s29   ;;  %s1072_s28 = sphi %s1141_s28, %s1443_s28   ;;  %s1068_s27 = sphi %s1139_s27, %s1442_s27  }
   0x6   : > { %s1164_s11 = sadd.s32 1, %s1080_s30   ;;  %s31_s12 = sadd.s32 1, %s1076_s29 }
   0x7   : > { %s28_s13 = ssub.s32 %s1080_s30, %s1164_s11  ;;  %p38_p0 = scmp.ne.s32.totalorder %s1076_s29, %s1072_s28 }
   0x8   : > { %p29_p1 = scmp.eq.s32.totalorder %s28_s13, 0  ;;  %p39_p2 = scmp.eq.s32.totalorder %s1080_s30, 0 }
   0x9   : > { %p44_p3 = scmp.ne.s32.totalorder %s1072_s28, %s1068_s27  ;;  %p45_p4 = scmp.eq.s32.totalorder %s1160_s9, 0 }
   0xa   : > { %s1176_s14 = scalar_select %p29_p1, %s1076_s29, %s31_s12  }
   0xb   : > { %p1178_p5 = por %p39_p2, %p38_p0  ;;  %p1182_p6 = por %p45_p4, %p44_p3 }
   0xc   : > { %1429 = sst [smem:[#allocation8_spill]] %s1176_s14  ;;  %p215_p7 = scmp.eq.s32.totalorder %s1160_s9, 1 }
   0xd   : > { %s1431_s16 = scalar_select %p1182_p6, 1, 0 }
   0xe   : > { %p221_p8 = scmp.eq.s32.totalorder %s896_s10, 1  ;;  %p933_p10 = scmp.lt.s32.totalorder %s1080_s30, 2 }
   0xf   : > { %p1189_p11 = por %p215_p7, %p38_p0  ;;  %s262_s19 = sand.u32 1, %s1076_s29  }
  0x10   : > { %p1193_p12 = por %p221_p8, %p44_p3  ;;  %s919_s20 = sshll.u32 %s1080_s30, 7 }
  0x11   : > { %s1432_s17 = scalar_select %p1189_p11, 1, 0 }
  0x12   : > { %s1433_s18 = scalar_select %p1193_p12, 1, 0 }
  0x13   : > { %s899_s21 = sshll.u32 %s262_s19, 3  ;;  %s1202_s24 = scalar_lea.hbm %s1418_s0, %s919_s20 }
  0x14   : > { %s266_s25 = scalar_lea.vmem [#allocation2], %s899_s21  ;;  %p1206_p13 = pnand %p933_p10, %p1178_p5 }
  0x15   : > { %s274_s26 = sshll.u32 %s266_s25, 4  ;;  %s263_s12 = scalar_lea.sflag [#allocation3], %s262_s19  ;;  %s1210_s26 = int_to_ptr.vmem [resolvable:$true] %s274_s26 }
  0x16   : > { %s988_s13 = scalar_lea.hbm %s1202_s24, 128  ;;  %p990_p3 = pneg %p1206_p13 }
  0x17   : > { %p989_p2 = scmp.ne.s32.totalorder %s1202_s24, %s988_s13  ;;  %s993_s15 = scalar_lea.hbm %s1418_s0, 256 }
  0x18   : > { %p994_p5 = scmp.lt.s32.totalorder %s1202_s24, %s1418_s0  ;;  %p995_p8 = scmp.lt.s32.totalorder %s993_s15, %s988_s13 }
  0x19   : > { %p991_p4 = pnand %p990_p3, %p989_p2 }
  0x1a   : > { %p996_p10 = por %p995_p8, %p994_p5 }
  0x1b   : > { %p992_p7 = pneg %p991_p4 }
  0x1d   : > { %p997_p9 = pnand %p996_p10, %p992_p7 }
  0x1f   : > { %1000 = shalt.err (!%p997_p9)
}
  0x20   : > { %s1001_s19 = scalar_lea.vmem %s1210_s26, 128  ;;  %s1082_s25 = smov [#allocation2]  }
  0x21   : > { %p1002_p0 = scmp.ne.s32.totalorder %s1210_s26, %s1001_s19  ;;  %s1006_s14 = sshll.u32 %s1082_s25, 4  ;;  %s1007_s14 = int_to_ptr.vmem [resolvable:$false] %s1006_s14 }
  0x22   : > { %s1008_s20 = scalar_lea.vmem %s1007_s14, 256  ;;  %p1009_p4 = scmp.lt.s32.totalorder %s1210_s26, %s1007_s14 }
  0x23   : > { %p1004_p1 = pnand %p1002_p0, %p990_p3  ;;  %p1010_p12 = scmp.lt.s32.totalorder %s1008_s20, %s1001_s19 }
  0x25   : > { %p1005_p2 = pneg %p1004_p1  ;;  %p1011_p11 = por %p1010_p12, %p1009_p4 }
  0x27   : > { %p1012_p6 = pnand %p1011_p11, %p1005_p2 }
  0x29   : > { %1015 = shalt.err (!%p1012_p6)
}
  0x2a   : > { %928 = dma.hbm_to_vmem [thread:$0]  (!%p1206_p13), %s1202_s24, 128, %s1210_s26, %s263_s12  }
  0x2b   : > { %p1435_p9 = scmp.lt.s32.totalorder %s1080_s30, 3  ;;  %p1436_p7 = scmp.ge.s32.totalorder %s1080_s30, 1 }
  0x2d   : > { %p280_p0 = pnand %p1436_p7, %p1435_p9 }
  0x2e   : > { %s1237_s13 = sand.u32 (!%p280_p0), 1, %s1072_s28   ;;  %p1437_p6 = scmp.ne.s32.totalorder (!%p280_p0), %s1431_s16, 0 }
  0x2f   : > { %283 = sbr.rel (%p280_p0) target bundleno = 856 (0x358), region = 52  ;;  %s903_s14 = sshll.u32 (!%p280_p0), %s1237_s13, 3 }
  0x30   : > { %s286_s21 = scalar_lea.sflag (!%p280_p0), [#allocation3], %s1237_s13  ;;  %s289_s10 = scalar_lea.vmem (!%p280_p0), [#allocation2], %s903_s14 }
  0x34   : > { %1059 = dma.done.wait (%p1437_p6), %s286_s21, 128  }
  0x35   : > { %1061 = vsyncadd (%p1437_p6), %s286_s21, 4294967168  ;;  %v1083_v0 = vmov 0.0   ;;  %v1084_v1 = vmov 0   ;;  %v322_v2 = vld [vmem:[%s289_s10] sm:$0xff]  ;;  %vm336_vm0 = vcmask 1043456   ;;  %vm332_vm1 = vcmask 31744  }
  0x36   : > { %405 = vmatprep.mubr.f32.mxu0 %v1083_v0  ;;  %977 = vset.pattern.permute.xlu0 %v1084_v1  ;;  %v324_v3 = vld [vmem:[%s1420_s2] sm:$0xff]  ;;  %v331_v4 = vcombine.high %v322_v2, %v322_v2  ;;  %s1085_s16 = smov 113   ;;  %s1086_s22 = smov 127   ;;  %v430_v23 = vlaneseq  ;;  %v423_v34 = vld [vmem:[%s1425_s7 + $0x8] sm:$0xff]  ;;  %vm610_vm8 = vcmask 1041408   ;;  %vm615_vm11 = vcmask 1045504  }
  0x37   : > { %705 = vmatprep.mubr.f32.mxu1 %v1083_v0  ;;  %978 = vset.pattern.permute.xlu1 %v1084_v1  ;;  %v323_v5 = vld [vmem:[%s1419_s1] sm:$0xff]  ;;  %s1087_s23 = smov 16   ;;  %s1088_s19 = smov 112   ;;  %v909_v1 = vld [vmem:[%s1425_s7 + $0x18] ss:$0 sm:$0xff]  ;;  %vm631_vm12 = vcmask 146432  }
  0x38   : > { %327 = vperm.xlu0 %977, %v324_v3   ;;  %905 = vmatprep.subr.msk.mxu0 %vm336_vm0, %v331_v4  ;;  %s1089_s25 = smov 15   ;;  %s1090_s20 = smov 111   ;;  %v725_v21 = vld [vmem:[%s1424_s6] sm:$0xf]  ;;  %v1283_v26 = vshrl.u32 %v430_v23, 7  ;;  %v1289_v31 = vand.u32 127, %v430_v23 }
  0x39   : > { %906 = vmatpush1.msk.msra.mxu0 %vm336_vm0, %v322_v2  ;;  %s1091_s21 = smov 17   ;;  %s1092_s10 = smov 1   ;;  %v625_v22 = vld [vmem:[%s1422_s4] sm:$0x3]  ;;  %vm731_vm13 = vcmask 64512  }
  0x3a   : > { %907 = vmatmul.mubr.msk.f32.vlgmr.msra.gmra.mxu0 %vm332_vm1, %v323_v5  ;;  %v498_v29 = vsub.s32 4, %v1283_v26  ;;  %v422_v30 = vld [vmem:[%s1425_s7] sm:$0xff]  ;;  %v532_v35 = vsub.s32 6, %v1283_v26  ;;  %v454_v36 = vsub.s32 1, %v1283_v26  ;;  %v549_v37 = vsub.s32 7, %v1283_v26  ;;  %p1438_p12 = scmp.ne.s32.totalorder %s1432_s17, 0 }
  0x3b   : > { %799 = vmatprep.mubr.f32.mxu0 %v1083_v0  ;;  %vm527_vm2 = vcmp.lt.s32.totalorder %v1289_v31, 113  ;;  %v471_v41 = vsub.s32 2, %v1283_v26  ;;  %vm449_vm3 = vcmp.lt.s32.totalorder %v1289_v31, 16  ;;  %vm544_vm4 = vcmp.lt.s32.totalorder %v1289_v31, 112  ;;  %v908_v0 = vld [vmem:[%s1425_s7 + $0x10] ss:$0 sm:$0xff] }
  0x3c   : > { %v499_v38 = vrot.slane %v422_v30, %v498_v29  ;;  %v503_v42 = vrot.slane %v423_v34, %v498_v29  ;;  %v533_v43 = vrot.slane %v422_v30, %v532_v35  ;;  %v537_v44 = vrot.slane %v423_v34, %v532_v35  ;;  %s1093_s24 = smov [#allocation5]  }
  0x3d   : > { %v455_v45 = vrot.slane %v422_v30, %v454_v36  ;;  %v459_v46 = vrot.slane %v423_v34, %v454_v36  ;;  %v550_v47 = vrot.slane %v422_v30, %v549_v37  ;;  %v515_v48 = vsub.s32 5, %v1283_v26 }
  0x3e   : > { %v554_v49 = vrot.slane %v423_v34, %v549_v37  ;;  %vm466_vm5 = vcmp.lt.s32.totalorder %v1289_v31, 15  ;;  %v437_v50 = vsub.s32 0, %v1283_v26  ;;  %v472_v55 = vrot.slane %v422_v30, %v471_v41 }
  0x3f   : > { %v488_v57 = vsub.s32 3, %v1283_v26  ;;  %v476_v58 = vrot.slane %v423_v34, %v471_v41  ;;  %vm561_vm6 = vcmp.lt.s32.totalorder %v1289_v31, 111  ;;  %vm510_vm7 = vcmp.lt.s32.totalorder %v1289_v31, 127 }
  0x40   : > { %v516_v60 = vrot.slane %v422_v30, %v515_v48  ;;  %v520_v61 = vrot.slane %v423_v34, %v515_v48  ;;  %vm432_vm9 = vcmp.lt.s32.totalorder %v1289_v31, 17  ;;  %v438_v2 = vrot.slane %v422_v30, %v437_v50 }
  0x41   : > { %v442_v3 = vrot.slane %v423_v34, %v437_v50  ;;  %vm483_vm10 = vcmp.lt.s32.totalorder %v1289_v31, 1 }
  0xb3   : > { %v328_v6 = vpop.permute.xlu0 %327 }
  0xfa   : > { %v407_v7 = vpop.f32.mrf.mxu0 }
  0xfb   : > { %v408_v8 = vadd.f32 %v407_v7, %v328_v6 }
  0xfc   : > { %v409_v9 = vpop.f32.mrf.mxu0 }
  0xfd   : > { %v414_v10 = vmul.f32 0.70710677, %v408_v8  ;;  %v410_v11 = vadd.f32 %v409_v9, %v328_v6  ;;  %v412_v14 = vmul.f32 0.5, %v408_v8  ;;  %v489_v8 = vrot.slane %v422_v30, %v488_v57 }
  0xff   : > { %980 = verf.f32 %v414_v10  ;;  %v415_v12 = vmul.f32 0.70710677, %v410_v11  ;;  %v413_v19 = vmul.f32 0.5, %v410_v11 }
 0x101   : > { %982 = verf.f32 %v415_v12 }
 0x10c   : > { %v981_v13 = vpop.eup %980 }
 0x10d   : > { %v418_v15 = vadd.f32 1.0, %v981_v13 }
 0x10e   : > { %v983_v16 = vpop.eup %982 }
 0x10f   : > { %v1255_v17 = vmul.f32 %v418_v15, %v412_v14  ;;  %v419_v18 = vadd.f32 1.0, %v983_v16  ;;  %v493_v15 = vrot.slane %v423_v34, %v488_v57 }
 0x111   : > { %523 = vrot.lane.b32.xlu1 %v1255_v17, %s1085_s16  ;;  %506 = vrot.lane.b32.xlu0 %v1255_v17, %s1086_s22  ;;  %v1259_v20 = vmul.f32 %v419_v18, %v413_v19  ;;  %v1305_v51 = vmul.f32 %v499_v38, %v1255_v17 }
 0x113   : > { %v505_v59 = vmul.f32 %v503_v42, %v1259_v20 }
 0x115   : > { %445 = vrot.lane.b32.xlu1 %v1255_v17, %s1087_s23  ;;  %525 = vrot.lane.b32.xlu0 %v1259_v20, %s1085_s16  ;;  %s920_s16 = sshll.u32 %s1160_s9, 7  ;;  %s1020_s9 = sshll.u32 %s1093_s24, 4  ;;  %s1021_s9 = int_to_ptr.vmem [resolvable:$false] %s1020_s9 }
 0x119   : > { %540 = vrot.lane.b32.xlu1 %v1255_v17, %s1088_s19  ;;  %447 = vrot.lane.b32.xlu0 %v1259_v20, %s1087_s23 }
 0x11d   : > { %462 = vrot.lane.b32.xlu1 %v1255_v17, %s1089_s25  ;;  %542 = vrot.lane.b32.xlu0 %v1259_v20, %s1088_s19 }
 0x121   : > { %557 = vrot.lane.b32.xlu1 %v1255_v17, %s1090_s20  ;;  %464 = vrot.lane.b32.xlu0 %v1259_v20, %s1089_s25 }
 0x125   : > { %426 = vrot.lane.b32.xlu1 %v1255_v17, %s1091_s21  ;;  %559 = vrot.lane.b32.xlu0 %v1259_v20, %s1090_s20  ;;  %s824_s20 = scalar_lea.hbm %s1426_s8, %s920_s16 }
 0x129   : > { %508 = vrot.lane.b32.xlu1 %v1259_v20, %s1086_s22  ;;  %428 = vrot.lane.b32.xlu0 %v1259_v20, %s1091_s21  ;;  %s321_s22 = scalar_lea.vmem [#allocation5], %s903_s14  ;;  %s812_s21 = scalar_lea.sflag [#allocation4], %s1237_s13 }
 0x12a   : > { %s826_s23 = sshll.u32 %s321_s22, 4  ;;  %s1022_s14 = scalar_lea.vmem %s1021_s9, 256  ;;  %s827_s23 = int_to_ptr.vmem [resolvable:$true] %s826_s23 }
 0x12b   : > { %p1023_p3 = scmp.lt.s32.totalorder %s827_s23, %s1021_s9 }
 0x12d   : > { %479 = vrot.lane.b32.xlu1 %v1255_v17, %s1092_s10  ;;  %481 = vrot.lane.b32.xlu0 %v1259_v20, %s1092_s10  ;;  %s1016_s10 = scalar_lea.vmem %s827_s23, 128 }
 0x12e   : > { %p1017_p11 = scmp.ne.s32.totalorder %s827_s23, %s1016_s10  ;;  %p1024_p5 = scmp.lt.s32.totalorder %s1022_s14, %s1016_s10 }
 0x130   : > { %p1018_p13 = pnand %p1017_p11, %p1438_p12  ;;  %p1025_p8 = por %p1024_p5, %p1023_p3 }
 0x131   : > { %728 = vperm.xlu0 %977, %v725_v21   ;;  %628 = vperm.xlu1 %978, %v625_v22  }
 0x132   : > { %p1019_p1 = pneg %p1018_p13 }
 0x134   : > { %p1026_p10 = pnand %p1025_p8, %p1019_p1 }
 0x183   : > { %v524_v24 = vpop.permute.xlu1 %523  ;;  %v1281_v25 = vpop.permute.xlu0 %506 }
 0x187   : > { %v446_v27 = vpop.permute.xlu1 %445  ;;  %v526_v28 = vpop.permute.xlu0 %525 }
 0x188   : > { %v528_v52 = vsel %vm527_vm2, %v524_v24, %v526_v28  ;;  %v529_v53 = vsel %vm527_vm2, %v526_v28, %v524_v24 }
 0x189   : > { %v1316_v62 = vmul.f32 %v533_v43, %v528_v52  ;;  %v539_v63 = vmul.f32 %v537_v44, %v529_v53 }
 0x18b   : > { %v541_v32 = vpop.permute.xlu1 %540  ;;  %v448_v33 = vpop.permute.xlu0 %447  ;;  %v600_v16 = vrot.slane %v1316_v62, 4  ;;  %v601_v18 = vrot.slane %v539_v63, 4 }
 0x18c   : > { %v450_v4 = vsel %vm449_vm3, %v446_v27, %v448_v33  ;;  %v451_v5 = vsel %vm449_vm3, %v448_v33, %v446_v27 }
 0x18d   : > { %v460_v19 = vmul.f32 %v455_v45, %v451_v5  ;;  %v461_v21 = vmul.f32 %v459_v46, %v450_v4 }
 0x18f   : > { %v463_v39 = vpop.permute.xlu1 %462  ;;  %v543_v40 = vpop.permute.xlu0 %542  ;;  %v576_v38 = vrot.slane %v460_v19, 6 }
 0x190   : > { %v545_v9 = vsel %vm544_vm4, %v541_v32, %v543_v40  ;;  %v546_v10 = vsel %vm544_vm4, %v543_v40, %v541_v32 }
 0x191   : > { %v555_v22 = vmul.f32 %v550_v47, %v545_v9  ;;  %v556_v23 = vmul.f32 %v554_v49, %v546_v10 }
 0x193   : > { %v558_v54 = vpop.permute.xlu1 %557  ;;  %v465_v56 = vpop.permute.xlu0 %464  ;;  %v606_v42 = vrot.slane %v555_v22, 2  ;;  %v607_v43 = vrot.slane %v556_v23, 2 }
 0x194   : > { %v467_v24 = vsel %vm466_vm5, %v463_v39, %v465_v56  ;;  %v468_v26 = vsel %vm466_vm5, %v465_v56, %v463_v39  ;;  %v577_v39 = vrot.slane %v461_v21, 6  ;;  %v724_v21 = vld [vmem:[%s1423_s5] sm:$0xf] }
 0x195   : > { %v477_v40 = vmul.f32 %v472_v55, %v468_v26  ;;  %v478_v41 = vmul.f32 %v476_v58, %v467_v24 }
 0x197   : > { %v427_v6 = vpop.permute.xlu1 %426  ;;  %v560_v7 = vpop.permute.xlu0 %559  ;;  %v582_v56 = vrot.slane %v477_v40, 4  ;;  %v583_v57 = vrot.slane %v478_v41, 4 }
 0x198   : > { %v562_v11 = vsel %vm561_vm6, %v558_v54, %v560_v7  ;;  %v563_v12 = vsel %vm561_vm6, %v560_v7, %v558_v54 }
 0x199   : > { %v572_v13 = vmul.f32 %v908_v0, %v562_v11  ;;  %v573_v14 = vmul.f32 %v909_v1, %v563_v12 }
 0x19b   : > { %v509_v27 = vpop.permute.xlu1 %508  ;;  %910 = vmatprep.subr.msk.mxu1 %vm610_vm8, %v573_v14  ;;  %v429_v28 = vpop.permute.xlu0 %428 }
 0x19c   : > { %v511_v29 = vsel %vm510_vm7, %v1281_v25, %v509_v27  ;;  %v512_v30 = vsel %vm510_vm7, %v509_v27, %v1281_v25  ;;  %v433_v32 = vsel %vm432_vm9, %v427_v6, %v429_v28  ;;  %v434_v33 = vsel %vm432_vm9, %v429_v28, %v427_v6  ;;  %911 = vmatpush1.msk.msra.mxu1 %vm610_vm8, %v572_v13 }
 0x19d   : > { %v521_v34 = vmul.f32 %v516_v60, %v511_v29  ;;  %v522_v35 = vmul.f32 %v520_v61, %v512_v30  ;;  %v443_v36 = vmul.f32 %v438_v2, %v434_v33  ;;  %v444_v37 = vmul.f32 %v442_v3, %v433_v32  ;;  %v624_v2 = vld [vmem:[%s1421_s3] sm:$0x3] }
 0x19f   : > { %v594_v44 = vrot.slane %v521_v34, 6  ;;  %v595_v25 = vrot.slane %v522_v35, 6  ;;  %v480_v45 = vpop.permute.xlu1 %479  ;;  %v482_v46 = vpop.permute.xlu0 %481  ;;  %v612_v49 = vsel %vm610_vm8, %v444_v37, %v577_v39  ;;  %v611_v50 = vsel %vm610_vm8, %v443_v36, %v576_v38 }
 0x1a0   : > { %v484_v47 = vsel %vm483_vm10, %v480_v45, %v482_v46  ;;  %v485_v48 = vsel %vm483_vm10, %v482_v46, %v480_v45  ;;  %v614_v0 = vsel %vm336_vm0, %v612_v49, %v583_v57 }
 0x1a1   : > { %v494_v52 = vmul.f32 %v489_v8, %v485_v48  ;;  %v495_v53 = vmul.f32 %v493_v15, %v484_v47  ;;  %v619_v54 = vsel %vm610_vm8, %v505_v59, %v595_v25  ;;  %v618_v55 = vsel %vm610_vm8, %v1305_v51, %v594_v44 }
 0x1a2   : > { %v621_v58 = vsel %vm336_vm0, %v619_v54, %v601_v18  ;;  %v620_v60 = vsel %vm336_vm0, %v618_v55, %v600_v16  ;;  %v613_v59 = vsel %vm336_vm0, %v611_v50, %v582_v56 }
 0x1a3   : > { %v588_v61 = vrot.slane %v494_v52, 2  ;;  %v589_v31 = vrot.slane %v495_v53, 2  ;;  %v623_v62 = vsel %vm615_vm11, %v621_v58, %v607_v43  ;;  %v622_v63 = vsel %vm615_vm11, %v620_v60, %v606_v42 }
 0x1a4   : > { %669 = vmatprep.subr.mxu1 %v623_v62 }
 0x1a5   : > { %670 = vmatpush1.msra.mxu1 %v622_v63  ;;  %v617_v51 = vsel %vm615_vm11, %v614_v0, %v589_v31  ;;  %v616_v1 = vsel %vm615_vm11, %v613_v59, %v588_v61 }
 0x1a6   : > { %671 = vmatprep.subr.mxu1 %v617_v51 }
 0x1a7   : > { %672 = vmatpush1.msra.mxu1 %v616_v1 }
 0x1a8   : > { %912 = vmatmul.mubr.msk.f32.vlgmr.msra.gmra.mxu1 %vm631_vm12, %v624_v2 }
 0x1ac   : > { %v629_v3 = vpop.permute.xlu1 %628  ;;  %v729_v24 = vpop.permute.xlu0 %728 }
 0x268   : > { %v707_v4 = vpop.f32.mrf.mxu1 }
 0x269   : > { %v708_v5 = vadd.f32 %v707_v4, %v629_v3 }
 0x26a   : > { %v709_v6 = vpop.f32.mrf.mxu1 }
 0x26b   : > { %v714_v7 = vmul.f32 0.70710677, %v708_v5  ;;  %v710_v8 = vadd.f32 %v709_v6, %v629_v3  ;;  %v712_v13 = vmul.f32 0.5, %v708_v5 }
 0x26d   : > { %984 = verf.f32 %v714_v7  ;;  %v715_v9 = vmul.f32 0.70710677, %v710_v8  ;;  %v713_v14 = vmul.f32 0.5, %v710_v8 }
 0x26f   : > { %986 = verf.f32 %v715_v9 }
 0x27a   : > { %v985_v10 = vpop.eup %984 }
 0x27b   : > { %v718_v11 = vadd.f32 1.0, %v985_v10 }
 0x27c   : > { %v987_v12 = vpop.eup %986 }
 0x27d   : > { %v719_v15 = vadd.f32 1.0, %v987_v12  ;;  %v720_v16 = vmul.f32 %v718_v11, %v712_v13 }
 0x27f   : > { %v721_v18 = vmul.f32 %v719_v15, %v713_v14  ;;  %v722_v22 = vsel %vm610_vm8, %v720_v16, %v1255_v17 }
 0x281   : > { %v723_v19 = vsel %vm610_vm8, %v721_v18, %v1259_v20 }
 0x282   : > { %765 = vmatprep.subr.mxu0 %v723_v19 }
 0x283   : > { %766 = vmatpush1.msra.mxu0 %v722_v22 }
 0x284   : > { %913 = vmatmul.mubr.msk.f32.vlgmr.msra.gmra.mxu0 %vm731_vm13, %v724_v21 }
 0x344   : > { %v801_v23 = vpop.f32.mrf.mxu0 }
 0x345   : > { %v802_v20 = vadd.f32 %v801_v23, %v729_v24 }
 0x346   : > { %v803_v26 = vpop.f32.mrf.mxu0 }
 0x347   : > { %v804_v27 = vadd.f32 %v803_v26, %v729_v24 }
 0x349   : > { %v808_v28 = vcombine.low %v802_v20, %v804_v27 }
 0x34b   : > { %810 = vst [vmem:[%s321_s22] sm:$0xff] %v808_v28 }
 0x34c   : > { %1029 = shalt.err (!%p1026_p10)
}
 0x34d   : > { %s1030_s26 = scalar_lea.hbm %s824_s20, 128  ;;  %s1034_s15 = scalar_lea.hbm %s1426_s8, 256 }
 0x34e   : > { %p1031_p2 = scmp.ne.s32.totalorder %s824_s20, %s1030_s26  ;;  %p1035_p7 = scmp.lt.s32.totalorder %s824_s20, %s1426_s8 }
 0x34f   : > { %p1036_p0 = scmp.lt.s32.totalorder %s1034_s15, %s1030_s26 }
 0x350   : > { %p1032_p4 = pnand %p1031_p2, %p1438_p12 }
 0x351   : > { %p1037_p6 = por %p1036_p0, %p1035_p7 }
 0x352   : > { %p1033_p9 = pneg %p1032_p4 }
 0x354   : > { %p1038_p11 = pnand %p1037_p6, %p1033_p9 }
 0x356   : > { %1041 = shalt.err (!%p1038_p11)
}
 0x357   : > { %923 = dma.vmem_to_hbm [thread:$0]  (%p1438_p12), %s827_s23, 128, %s824_s20, %s812_s21  }
 0x358 PF: > { %s838_s19 = sand.u32 1, %s1068_s27   ;;  %p1439_p13 = scmp.ne.s32.totalorder %s1433_s18, 0 }
 0x359   : > { %p1440_p1 = scmp.ge.s32.totalorder %s1080_s30, 2  ;;  %s839_s25 = scalar_lea.sflag [#allocation4], %s838_s19 }
 0x35b   : > { %p930_p3 = pnand %p1440_p1, %p1439_p13 }
 0x35d   : > { %p931_p5 = pneg %p930_p3 }
 0x35f   : > { %1063 = dma.done.wait (%p931_p5), %s839_s25, 128  }
 0x360   : > { %1065 = vsyncadd (%p931_p5), %s839_s25, 4294967168  ;;  %s1441_s10 = sld [smem:[#allocation8_spill]]  ;;  %p21_p8 = scmp.ge.s32.totalorder %s1164_s11, 4  }
 0x361   : > { %s1442_s27 = smov %s1072_s28  ;;  %s1443_s28 = smov %s1076_s29 }
 0x362   : > { %s1445_s30 = smov %s1164_s11  ;;  %23 = sbr.rel (!%p21_p8) target bundleno = 5 (0x5), region = 97 }
 0x366   : > { %s1444_s29 = smov %s1441_s10 }
 0x367   :  { %844 = vsyncpa [#allocation3], 1 }
 0x368   :  { %846 = vsyncpa [#allocation3 + $0x1], 1 }
 0x369   :  { %847 = vsyncpa [#allocation4], 1 }
 0x36a   :  { %849 = vsyncpa [#allocation4 + $0x1], 1 }

</bundles_post_ra>
